<compile_context>
chip_gen: v7x
topology: tpu7x:2x2x1
jax: 0.10.0
libtpu: 0.0.40
codegen_flags: <defaults>
</compile_context>

<pallas_src>
import functools

import jax
import jax.numpy as jnp
from jax import lax
from jax.experimental import pallas as pl
from jax.experimental.pallas import tpu as pltpu

_INV_SQRT2 = 0.7071067811865476
_SQRT_2_OVER_PI = 0.7978845608028654


def _round_up(n, m):
    return ((n + m - 1) // m) * m


def _gelu(y, approx):
    if approx:
        # tanh approximation: transcendental runs on the EUP (separate VLIW slot).
        return 0.5 * y * (1.0 + jnp.tanh(_SQRT_2_OVER_PI * (y + 0.044715 * y * y * y)))
    # Exact erf form (matches nn.GELU() default).
    return 0.5 * y * (1.0 + lax.erf(y * jnp.float32(_INV_SQRT2)))


# --------------------------------------------------------------------------- kernels
def _block_kernel_resident(x_ref, wt_ref, b_ref, o_ref, *, approx_gelu):
    # x_ref: (tm, size_p)  wt_ref: (size_p, size_p) resident  b_ref: (1, size_p) f32
    y = jnp.dot(x_ref[...], wt_ref[...], preferred_element_type=jnp.float32)
    y = y + b_ref[...]
    g = _gelu(y, approx_gelu)
    # Re-read x for the residual: keeps the native-dtype tile's live range short.
    o_ref[...] = (x_ref[...].astype(jnp.float32) + g).astype(o_ref.dtype)


def _block_kernel_ntiled(x_ref, xr_ref, wt_ref, b_ref, o_ref, *, approx_gelu):
    # x_ref:  (tm, size_p) full-K row tile (matmul operand)
    # xr_ref: (tm, tn)     column tile of x for the residual
    # wt_ref: (size_p, tn) weight column block   b_ref: (1, tn)   o_ref: (tm, tn)
    y = jnp.dot(x_ref[...], wt_ref[...], preferred_element_type=jnp.float32)
    y = y + b_ref[...]
    g = _gelu(y, approx_gelu)
    o_ref[...] = (xr_ref[...].astype(jnp.float32) + g).astype(o_ref.dtype)


# --------------------------------------------------------------------------- helpers
def prepare_params(weight, bias, activation_dtype=jnp.float32):
    """One-time parameter prep: transpose the PyTorch (out, in) weight to (in, out),
    zero-pad the feature dim to a multiple of 128 (lane-dense), cast the weight to
    the activation dtype (so bf16 activations get a native bf16 MXU matmul) and
    store the bias in f32."""
    size = weight.shape[0]
    size_p = _round_up(size, 128)
    wt = jnp.asarray(weight).T.astype(activation_dtype)
    wt = jnp.pad(wt, ((0, size_p - size), (0, size_p - size)))
    b2 = jnp.pad(jnp.asarray(bias, dtype=jnp.float32), (0, size_p - size))
    return wt, b2.reshape(1, size_p)


def _vmem_capacity_bytes():
    try:
        info = pltpu.get_tpu_info()
        cap = getattr(info, "vmem_capacity_bytes", None)
        if cap:
            return int(cap)
    except Exception:
        pass
    return 64 << 20  # conservative: v7x per-TensorCore VMEM


def _pick_tm(batch):
    batch8 = max(8, _round_up(batch, 8))
    if batch8 >= 512:
        return 256  # matches 256-wide MXU (v6e/v7x), amortizes grid-step overhead
    if batch8 >= 16:
        # at least two grid steps so both v7x TensorCores get work
        return _round_up((batch8 + 1) // 2, 8)
    return batch8


def _call_resident(batch_p, size_p, tm, out_dtype, approx_gelu, vmem_limit):
    kernel = functools.partial(_block_kernel_resident, approx_gelu=approx_gelu)
    return pl.pallas_call(
        kernel,
        out_shape=jax.ShapeDtypeStruct((batch_p, size_p), out_dtype),
        grid_spec=pltpu.PrefetchScalarGridSpec(
            num_scalar_prefetch=0,
            grid=(batch_p // tm,),
            in_specs=[
                pl.BlockSpec((tm, size_p), lambda i: (i, 0)),        # x tile (streamed)
                pl.BlockSpec((size_p, size_p), lambda i: (0, 0)),    # weight (resident)
                pl.BlockSpec((1, size_p), lambda i: (0, 0)),         # bias (resident)
            ],
            out_specs=pl.BlockSpec((tm, size_p), lambda i: (i, 0)),
        ),
        compiler_params=pltpu.CompilerParams(
            dimension_semantics=("parallel",),
            vmem_limit_bytes=vmem_limit,
        ),
    )


def _call_ntiled(batch_p, size_p, tm, tn, out_dtype, approx_gelu, vmem_limit):
    kernel = functools.partial(_block_kernel_ntiled, approx_gelu=approx_gelu)
    return pl.pallas_call(
        kernel,
        out_shape=jax.ShapeDtypeStruct((batch_p, size_p), out_dtype),
        grid_spec=pltpu.PrefetchScalarGridSpec(
            num_scalar_prefetch=0,
            grid=(batch_p // tm, size_p // tn),
            in_specs=[
                pl.BlockSpec((tm, size_p), lambda i, j: (i, 0)),   # full-K row tile
                pl.BlockSpec((tm, tn), lambda i, j: (i, j)),       # x column tile (residual)
                pl.BlockSpec((size_p, tn), lambda i, j: (0, j)),   # weight column block
                pl.BlockSpec((1, tn), lambda i, j: (0, j)),        # bias column block
            ],
            out_specs=pl.BlockSpec((tm, tn), lambda i, j: (i, j)),
        ),
        compiler_params=pltpu.CompilerParams(
            dimension_semantics=("parallel", "parallel"),
            vmem_limit_bytes=vmem_limit,
        ),
    )


# --------------------------------------------------------------------------- forward
@functools.partial(jax.jit, static_argnames=("approx_gelu", "force_ntiled"))
def block_forward(x, wt, b2, approx_gelu=False, force_ntiled=False):
    """x: (batch, size); wt/b2: outputs of prepare_params (padded, (in, out))."""
    batch, size = x.shape
    size_p = wt.shape[1]
    tm = _pick_tm(batch)
    batch_p = _round_up(batch, tm)

    x_p = x
    if batch_p != batch or size_p != size:
        # Pad under jit so XLA fuses it with surrounding ops (no eager HBM pass).
        x_p = jnp.pad(x, ((0, batch_p - batch), (0, size_p - size)))

    x_bytes = jnp.dtype(x.dtype).itemsize
    w_bytes = jnp.dtype(wt.dtype).itemsize
    cap = _vmem_capacity_bytes()
    budget = int(cap * 0.7)

    # Resident-weight VMEM estimate (double-buffered weight + x/out tiles + f32 temps).
    est_res = (2 * size_p * size_p * w_bytes
               + 2 * size_p * 4
               + 2 * tm * size_p * (2 * x_bytes)
               + 3 * tm * size_p * 4)

    use_ntiled = force_ntiled or est_res > budget

    if not use_ntiled:
        vmem_limit = None
        if est_res > (14 << 20):
            vmem_limit = min(int(est_res * 1.3), cap - (2 << 20))
        out_p = _call_resident(batch_p, size_p, tm, x.dtype, approx_gelu,
                               vmem_limit)(x_p, wt, b2)
    else:
        def est_n(tn_):
            return (2 * size_p * tn_ * w_bytes + 2 * tn_ * 4
                    + 2 * tm * size_p * x_bytes          # x row tiles
                    + 2 * tm * tn_ * (2 * x_bytes)       # x column + out tiles
                    + 3 * tm * tn_ * 4)                  # f32 temps

        tn = size_p
        while tn > 128 and est_n(tn) > budget:
            half = tn // 2
            if half % 128 == 0 and size_p % half == 0:
                tn = half
            else:
                break
        vmem_limit = None
        if est_n(tn) > (14 << 20):
            vmem_limit = min(int(est_n(tn) * 1.3), cap - (2 << 20))
        out_p = _call_ntiled(batch_p, size_p, tm, tn, x.dtype, approx_gelu,
                             vmem_limit)(x_p, x_p, wt, b2)

    if batch_p != batch or size_p != size:
        out_p = out_p[:batch, :size]
    return out_p


def block_reference(x, weight, bias):
    y = jnp.dot(x, weight.T, precision=lax.Precision.HIGHEST) + bias
    return x + 0.5 * y * (1.0 + lax.erf(y * jnp.float32(_INV_SQRT2)))


if __name__ == "__main__":
    key = jax.random.PRNGKey(0)
    k_x, k_w, k_b = jax.random.split(key, 3)

    batch, size = 8, 32
    x = jax.random.normal(k_x, (batch, size), dtype=jnp.float32)

    # Deterministic parameter init (PyTorch-Linear-like uniform bound 1/sqrt(size)).
    bound = 1.0 / (size ** 0.5)
    weight = jax.random.uniform(k_w, (size, size), jnp.float32, -bound, bound)
    bias = jax.random.uniform(k_b, (size,), jnp.float32, -bound, bound)

    # One-time param prep (transpose + lane-dense padding + dtype alignment).
    wt, b2 = prepare_params(weight, bias, activation_dtype=x.dtype)

    ref = jax.block_until_ready(block_reference(x, weight, bias))

    # Resident-weight path (default for small/mid size).
    out = jax.block_until_ready(block_forward(x, wt, b2))
    assert out.shape == (batch, size)
    # Tolerance accounts for the MXU's reduced-precision handling of f32 matmuls.
    assert jnp.allclose(out, ref, atol=1e-2, rtol=1e-2), "resident path mismatch"

    # N-tiled path (used automatically for large weights / v7x); exercised here too.
    out2 = jax.block_until_ready(block_forward(x, wt, b2, force_ntiled=True))
    assert out2.shape == (batch, size)
    assert jnp.allclose(out2, ref, atol=1e-2, rtol=1e-2), "ntiled path mismatch"

    print("KERNEL_OK")
</pallas_src>

<mosaic_0001>
module attributes {stable_mosaic.version = 11 : i64} {
  func.func @_block_kernel_resident(%arg0: i32, %arg1: memref<8x128xf32, #tpu.memory_space<vmem>>, %arg2: memref<128x128xf32, #tpu.memory_space<vmem>>, %arg3: memref<1x128xf32, #tpu.memory_space<vmem>>, %arg4: memref<8x128xf32, #tpu.memory_space<vmem>>) attributes {dimension_semantics = [#tpu.dimension_semantics<parallel>], iteration_bounds = array<i64: 1>, scalar_prefetch = 0 : i64, scratch_operands = 0 : i64, tpu.core_type = #tpu.core_type<tc>, window_params = [{transform_indices = @transform_0, window_bounds = array<i64: 8, 128>}, {pipeline_mode = #tpu.pipeline_mode<synchronous>, transform_indices = @transform_1, window_bounds = array<i64: 128, 128>}, {pipeline_mode = #tpu.pipeline_mode<synchronous>, transform_indices = @transform_2, window_bounds = array<i64: 1, 128>}, {transform_indices = @transform_3, window_bounds = array<i64: 8, 128>}]} {
    %c0 = arith.constant 0 : index
    %c0_0 = arith.constant 0 : index
    %0 = vector.load %arg1[%c0, %c0_0] : memref<8x128xf32, #tpu.memory_space<vmem>>, vector<8x128xf32>
    %c0_1 = arith.constant 0 : index
    %c0_2 = arith.constant 0 : index
    %1 = vector.load %arg2[%c0_1, %c0_2] : memref<128x128xf32, #tpu.memory_space<vmem>>, vector<128x128xf32>
    %cst = arith.constant dense<0.000000e+00> : vector<8x128xf32>
    %2 = tpu.matmul %0, %1, %cst {dimension_numbers = #tpu.dot_dimension_numbers<[1], [0], [0], [1], [0, 0, 1, 1], [], []>} : vector<8x128xf32>, vector<128x128xf32>, vector<8x128xf32> -> vector<8x128xf32>
    %c0_3 = arith.constant 0 : index
    %c0_4 = arith.constant 0 : index
    %3 = vector.load %arg3[%c0_3, %c0_4] : memref<1x128xf32, #tpu.memory_space<vmem>>, vector<1x128xf32>
    %4 = vector.broadcast %3 : vector<1x128xf32> to vector<8x128xf32>
    %5 = arith.addf %2, %4 : vector<8x128xf32>
    %cst_5 = arith.constant 5.000000e-01 : f32
    %6 = vector.broadcast %cst_5 : f32 to vector<8x128xf32>
    %7 = arith.mulf %6, %5 : vector<8x128xf32>
    %cst_6 = arith.constant 0.707106769 : f32
    %8 = vector.broadcast %cst_6 : f32 to vector<8x128xf32>
    %9 = arith.mulf %5, %8 : vector<8x128xf32>
    %10 = math.erf %9 : vector<8x128xf32>
    %cst_7 = arith.constant 1.000000e+00 : f32
    %11 = vector.broadcast %cst_7 : f32 to vector<8x128xf32>
    %12 = arith.addf %11, %10 : vector<8x128xf32>
    %13 = arith.mulf %7, %12 : vector<8x128xf32>
    %c0_8 = arith.constant 0 : index
    %c0_9 = arith.constant 0 : index
    %14 = vector.load %arg1[%c0_8, %c0_9] : memref<8x128xf32, #tpu.memory_space<vmem>>, vector<8x128xf32>
    %15 = arith.addf %14, %13 : vector<8x128xf32>
    %c0_10 = arith.constant 0 : index
    %c0_11 = arith.constant 0 : index
    %16 = vector.load %arg4[%c0_10, %c0_11] : memref<8x128xf32, #tpu.memory_space<vmem>>, vector<8x128xf32>
    tpu.vector_store %arg4[%c0_10, %c0_11], %15 {strides = array<i32>} : memref<8x128xf32, #tpu.memory_space<vmem>>, vector<8x128xf32>,
    return
  }
  func.func @transform_0(%arg0: i32) -> (i32, i32) {
    %c0_i32 = arith.constant 0 : i32
    %c0_i32_0 = arith.constant 0 : i32
    return %arg0, %c0_i32 : i32, i32
  }
  func.func @transform_1(%arg0: i32) -> (i32, i32) {
    %c0_i32 = arith.constant 0 : i32
    %c0_i32_0 = arith.constant 0 : i32
    %c0_i32_1 = arith.constant 0 : i32
    return %c0_i32, %c0_i32_0 : i32, i32
  }
  func.func @transform_2(%arg0: i32) -> (i32, i32) {
    %c0_i32 = arith.constant 0 : i32
    %c0_i32_0 = arith.constant 0 : i32
    %c0_i32_1 = arith.constant 0 : i32
    return %c0_i32, %c0_i32_0 : i32, i32
  }
  func.func @transform_3(%arg0: i32) -> (i32, i32) {
    %c0_i32 = arith.constant 0 : i32
    %c0_i32_0 = arith.constant 0 : i32
    return %arg0, %c0_i32 : i32, i32
  }
}

</mosaic_0001>

<bundles_post_ra>
// kernel: block_forward.1
= control target key start
LH: loop header
LB: loop body
LE: loop exit
PB: predicated region body
PF: predicated region fallthrough
CT: control target
= control target key end

     0   :  { %8 = vsyncpa [#allocation3], 0  ;;  %s336_s0 = inlined_call_operand.vmem [shape: f32[8,128], index: 0, kind: input, shape index: {}]   ;;  %s337_s1 = inlined_call_operand.hbm [shape: f32[128,128], index: 1, kind: input, shape index: {}]   ;;  %s338_s2 = inlined_call_operand.vmem [shape: f32[1,128], index: 2, kind: input, shape index: {}]   ;;  %s339_s3 = inlined_call_operand.hbm [shape: f32[8,128], index: 3, kind: output, shape index: {}]  }
   0x1   :  { %9 = vsyncpa [#allocation4], 0  ;;  %s279_s12 = smov [#allocation2]   ;;  %s231_s16 = scalar_lea.hbm %s337_s1, 2048 }
   0x2   :  { %s17_s13 = sshll.u32 %s279_s12, 4  ;;  %p232_p0 = scmp.ne.s32.totalorder %s337_s1, %s231_s16  ;;  %s18_s13 = int_to_ptr.vmem [resolvable:$true] %s17_s13 }
   0x3   :  { %p235_p1 = scmp.lt.u32.totalorder %s231_s16, %s337_s1 }
   0x5   :  { %p237_p2 = pnand %p235_p1, %p232_p0 }
   0x7   :  { %240 = shalt.err (!%p237_p2)
}
   0x8   :  { %s241_s21 = scalar_lea.vmem %s18_s13, 2048  ;;  %p246_p4 = scmp.lt.s32.totalorder %s18_s13, %s18_s13 }
   0x9   :  { %p242_p3 = scmp.ne.s32.totalorder %s18_s13, %s241_s21  ;;  %p247_p5 = scmp.lt.s32.totalorder %s241_s21, %s241_s21 }
   0xb   :  { %p248_p6 = por %p247_p5, %p246_p4 }
   0xd   :  { %p249_p7 = pnand %p248_p6, %p242_p3 }
   0xf   :  { %252 = shalt.err (!%p249_p7)
}
  0x10   :  { %s280_s22 = smov 128   ;;  %s281_s23 = smov 8  }
  0x11   :  { %23 = dma.hbm_to_vmem [thread:$0]  %s337_s1, 2048, %s18_s13, [#allocation3], %s280_s22, %s280_s22, %s281_s23  }
  0x12   :  { %275 = dma.done.wait [#allocation3], 2048  }
  0x13   :  { %276 = vsyncadd [#allocation3], 4294965248  ;;  %v282_v0 = vmov 0.0|0.0   ;;  %vm283_vm0 = vmmov 0   ;;  %v284_v1 = vmov 0.0   ;;  %v30_v2 = vld [vmem:[#allocation2] sm:$0xff] }
  0x14   :  { %198 = vmatprep.subr.bf16.mxu0 %v282_v0  ;;  %195 = vmatprep.mubr.msk.f32.mxu0 %vm283_vm0, %v284_v1  ;;  %v31_v3 = vld [vmem:[#allocation2 + $0x8] sm:$0xff]  ;;  %v32_v4 = vld [vmem:[#allocation2 + $0x10] sm:$0xff]  ;;  %v33_v6 = vld [vmem:[#allocation2 + $0x18] sm:$0xff]  ;;  %s285_s29 = smov [#allocation5]  }
  0x15   :  { %v199_v5 = vpack.c.bf16 %v31_v3, %v30_v2  ;;  %v202_v7 = vpack.c.bf16 %v33_v6, %v32_v4  ;;  %v34_v8 = vld [vmem:[#allocation2 + $0x20] sm:$0xff]  ;;  %v35_v9 = vld [vmem:[#allocation2 + $0x28] sm:$0xff]  ;;  %v36_v11 = vld [vmem:[#allocation2 + $0x30] sm:$0xff]  ;;  %s136_s30 = sshll.u32 %s285_s29, 4  ;;  %s137_s30 = int_to_ptr.vmem [resolvable:$true] %s136_s30 }
  0x16   :  { %v205_v10 = vpack.c.bf16 %v35_v9, %v34_v8  ;;  %v37_v12 = vld [vmem:[#allocation2 + $0x38] sm:$0xff]  ;;  %v38_v14 = vld [vmem:[#allocation2 + $0x40] sm:$0xff]  ;;  %v39_v15 = vld [vmem:[#allocation2 + $0x48] sm:$0xff]  ;;  %p258_p9 = scmp.lt.s32.totalorder %s137_s30, %s137_s30 }
  0x17   :  { %200 = vmatpush3.bf16.msra.mxu0 %v199_v5  ;;  %v208_v13 = vpack.c.bf16 %v37_v12, %v36_v11  ;;  %v211_v16 = vpack.c.bf16 %v39_v15, %v38_v14  ;;  %v40_v17 = vld [vmem:[#allocation2 + $0x50] sm:$0xff]  ;;  %v41_v18 = vld [vmem:[#allocation2 + $0x58] sm:$0xff]  ;;  %v42_v20 = vld [vmem:[#allocation2 + $0x60] sm:$0xff] }
  0x18   :  { %201 = vmatprep.subr.bf16.mxu0 %v282_v0  ;;  %v214_v19 = vpack.c.bf16 %v41_v18, %v40_v17  ;;  %v43_v21 = vld [vmem:[#allocation2 + $0x68] sm:$0xff]  ;;  %v44_v23 = vld [vmem:[#allocation2 + $0x70] sm:$0xff]  ;;  %v45_v24 = vld [vmem:[#allocation2 + $0x78] sm:$0xff] }
  0x19   :  { %v217_v22 = vpack.c.bf16 %v43_v21, %v42_v20  ;;  %v220_v25 = vpack.c.bf16 %v45_v24, %v44_v23  ;;  %v29_v26 = vld [vmem:[%s336_s0] sm:$0xff]  ;;  %s253_s0 = scalar_lea.vmem %s137_s30, 128 }
  0x1a   :  { %v145_v27 = vld [vmem:[%s338_s2] ss:$0 sm:$0xff]  ;;  %p254_p8 = scmp.ne.s32.totalorder %s137_s30, %s253_s0  ;;  %p259_p10 = scmp.lt.s32.totalorder %s253_s0, %s253_s0 }
  0x1b   :  { %203 = vmatpush3.bf16.msra.mxu0 %v202_v7 }
  0x1c   :  { %204 = vmatprep.subr.bf16.mxu0 %v282_v0  ;;  %p260_p11 = por %p259_p10, %p258_p9 }
  0x1e   :  { %p261_p12 = pnand %p260_p11, %p254_p8 }
  0x1f   :  { %206 = vmatpush3.bf16.msra.mxu0 %v205_v10 }
  0x20   :  { %207 = vmatprep.subr.bf16.mxu0 %v282_v0 }
  0x23   :  { %209 = vmatpush3.bf16.msra.mxu0 %v208_v13 }
  0x24   :  { %210 = vmatprep.subr.bf16.mxu0 %v282_v0 }
  0x27   :  { %212 = vmatpush3.bf16.msra.mxu0 %v211_v16 }
  0x28   :  { %213 = vmatprep.subr.bf16.mxu0 %v282_v0 }
  0x2b   :  { %215 = vmatpush3.bf16.msra.mxu0 %v214_v19 }
  0x2c   :  { %216 = vmatprep.subr.bf16.mxu0 %v282_v0 }
  0x2f   :  { %218 = vmatpush3.bf16.msra.mxu0 %v217_v22 }
  0x30   :  { %219 = vmatprep.subr.bf16.mxu0 %v282_v0 }
  0x33   :  { %221 = vmatpush3.bf16.msra.mxu0 %v220_v25 }
  0x36   :  { %196 = vmatmul.mubr.f32.vlgmr.msra.gmra.mrb[0].mxu0 %v29_v26 }
 0x109   :  { %v119_v28 = vpop.f32.mrb[0].mxu0 }
 0x10a   :  { %v120_v29 = vadd.f32 %v145_v27, %v119_v28  ;;  %v197_v30 = vpop.f32.mrb[1].mxu0 }
 0x10c   :  { %v124_v31 = vmul.f32 0.70710677, %v120_v29  ;;  %v123_v33 = vmul.f32 0.5, %v120_v29 }
 0x10e   :  { %229 = verf.f32 %v124_v31 }
 0x118   :  { %v230_v32 = vpop.eup %229 }
 0x119   :  { %v126_v34 = vadd.f32 1.0, %v230_v32 }
 0x11b   :  { %v127_v35 = vmul.f32 %v126_v34, %v123_v33 }
 0x11d   :  { %v128_v36 = vadd.f32 %v127_v35, %v29_v26 }
 0x11f   :  { %129 = vst [vmem:[#allocation5] sm:$0xff] %v128_v36 }
 0x120   :  { %264 = shalt.err (!%p261_p12)
}
 0x121   :  { %s265_s5 = scalar_lea.hbm %s339_s3, 128 }
 0x122   :  { %p266_p13 = scmp.ne.s32.totalorder %s339_s3, %s265_s5  ;;  %p269_p0 = scmp.lt.u32.totalorder %s265_s5, %s339_s3 }
 0x124   :  { %p271_p1 = pnand %p269_p0, %p266_p13 }
 0x126   :  { %274 = shalt.err (!%p271_p1)
}
 0x127   :  { %139 = dma.vmem_to_hbm [thread:$0]  %s137_s30, 128, %s339_s3, [#allocation4]  }
 0x128   :  { %277 = dma.done.wait [#allocation4], 128  }
 0x129   :  { %278 = vsyncadd [#allocation4], 4294967168 }
 0x12a   :  { %143 = vsyncpa [#allocation3], 1 }
 0x12b   :  { %144 = vsyncpa [#allocation4], 1 }

</bundles_post_ra>
